<compile_context>
chip_gen: v7x
topology: tpu7x:2x2x1
jax: 0.10.0
libtpu: 0.0.40
codegen_flags: <defaults>
</compile_context>

<pallas_src>
import functools

import jax
import jax.numpy as jnp
from jax.experimental import pallas as pl
from jax.experimental.pallas import tpu as pltpu

_LANE = 128
_VMEM_BUDGET = 44 * 1024 * 1024   # pipelined-buffer budget (v7x has 64 MiB / TC)
_VMEM_LIMIT = 52 * 1024 * 1024    # scoped VMEM limit handed to Mosaic


def _round_up(x, m):
    return (x + m - 1) // m * m


# --------------------------------------------------------------------------- #
# Kernels
# --------------------------------------------------------------------------- #
def _hidden_block(x_ref, w12_ref, b12_ref, *, th, compute_dtype, approx):
    """One hidden block: SiLU(x @ w1_h + b1_h) * (x @ w2_h + b2_h), f32 values."""
    x = x_ref[...]
    if x.dtype != compute_dtype:
        x = x.astype(compute_dtype)
    w12 = w12_ref[...]
    if w12.dtype != compute_dtype:
        w12 = w12.astype(compute_dtype)

    # One fused MXU matmul produces this hidden block's x1 and x2 halves.
    x12 = jnp.dot(x, w12, preferred_element_type=jnp.float32)
    x12 = x12 + b12_ref[...]               # f32 bias broadcast over token rows
    x1 = x12[:, :th]                       # lane-aligned static slices (th % 128 == 0)
    x2 = x12[:, th:]

    # SiLU via exp + reciprocal: both land on the EUP slot and hide under the MXU.
    sig = pl.reciprocal(1.0 + jnp.exp(-x1), approx=approx)
    return (x1 * sig) * x2


def _swiglu_stream_kernel(x_ref, w12_ref, b12_ref, w3_ref, b3_ref, o_ref, acc_ref,
                          *, th, compute_dtype, approx):
    """Hidden dimension streamed over grid axis 1 with an f32 VMEM accumulator."""
    h = pl.program_id(1)

    @pl.when(h == 0)
    def _init():
        acc_ref[...] = jnp.zeros_like(acc_ref)

    hidden = _hidden_block(x_ref, w12_ref, b12_ref, th=th,
                           compute_dtype=compute_dtype, approx=approx)
    w3 = w3_ref[...]
    if w3.dtype != compute_dtype:
        w3 = w3.astype(compute_dtype)
    acc_ref[...] += jnp.dot(hidden.astype(compute_dtype), w3,
                            preferred_element_type=jnp.float32)

    @pl.when(h == pl.num_programs(1) - 1)
    def _finalize():
        # ffn_ln = nn.Identity (subln=False default); Dropout(p=0.0) -> identity.
        # TODO(synk): add LayerNorm over the hidden axis here if subln=True is needed.
        o_ref[...] = (acc_ref[...] + b3_ref[...]).astype(o_ref.dtype)


def _swiglu_resident_kernel(x_ref, w12_ref, b12_ref, w3_ref, b3_ref, o_ref,
                            *, th, compute_dtype, approx):
    """Weights fully VMEM-resident (nH == 1): no accumulator, no init/finalize."""
    hidden = _hidden_block(x_ref, w12_ref, b12_ref, th=th,
                           compute_dtype=compute_dtype, approx=approx)
    w3 = w3_ref[...]
    if w3.dtype != compute_dtype:
        w3 = w3.astype(compute_dtype)
    out = jnp.dot(hidden.astype(compute_dtype), w3,
                  preferred_element_type=jnp.float32)
    o_ref[...] = (out + b3_ref[...]).astype(o_ref.dtype)


# --------------------------------------------------------------------------- #
# Parameter preparation (hoisted out of the per-call forward path)
# --------------------------------------------------------------------------- #
def prepare_swiglu_params(w1, b1, w2, b2, w3, b3, *, th=1024, param_dtype=None):
    """Fuse/pad the SwiGLU weights once at parameter-load time.

    w1, w2: (D_in, H); w3: (H, D_out)  (pre-transposed nn.Linear weights)
    b1, b2: (H,),  b3: (D_out,)
    th: hidden-block width (rounded to a multiple of 128, shrunk to fit VMEM).
    """
    if param_dtype is not None:
        w1, w2, w3 = (w1.astype(param_dtype), w2.astype(param_dtype),
                      w3.astype(param_dtype))
    D_in, H = w1.shape
    D_out = w3.shape[1]
    D_out_p = _round_up(D_out, _LANE)

    # Hidden-block width: multiple of 128, capped at padded H, shrunk until the
    # double-buffered weight blocks use at most half the VMEM budget.
    th = max(_LANE, _round_up(min(th, _round_up(H, _LANE)), _LANE))
    bytes_w = jnp.dtype(w1.dtype).itemsize

    def _w_bytes(t):
        return 2 * bytes_w * (D_in * 2 * t + t * D_out_p)

    while th > _LANE and _w_bytes(th) > _VMEM_BUDGET // 2:
        th = max(_LANE, _round_up(th // 2, _LANE))

    H_p = _round_up(H, th)
    nH = H_p // th

    # Zero padding is exact: padded hidden units give SiLU(0)*0 = 0 and padded
    # output lanes are sliced off in swiglu_apply.
    w1_p = jnp.pad(w1, ((0, 0), (0, H_p - H)))
    w2_p = jnp.pad(w2, ((0, 0), (0, H_p - H)))
    w3_p = jnp.pad(w3, ((0, H_p - H), (0, D_out_p - D_out)))
    b1_p = jnp.pad(b1.reshape(-1).astype(jnp.float32), (0, H_p - H))
    b2_p = jnp.pad(b2.reshape(-1).astype(jnp.float32), (0, H_p - H))
    b3_p = jnp.pad(b3.reshape(-1).astype(jnp.float32),
                   (0, D_out_p - D_out)).reshape(1, D_out_p)

    # Interleave w1/w2 per hidden block so fused block h is exactly [w1_h | w2_h]
    # and a SINGLE MXU matmul per block yields both x1 and x2.
    w12 = jnp.concatenate(
        [w1_p.reshape(D_in, nH, th), w2_p.reshape(D_in, nH, th)],
        axis=-1).reshape(D_in, 2 * H_p)
    b12 = jnp.concatenate(
        [b1_p.reshape(nH, th), b2_p.reshape(nH, th)],
        axis=-1).reshape(1, 2 * H_p)

    return dict(w12=w12, b12=b12, w3=w3_p, b3=b3_p,
                th=th, H_p=H_p, D_in=D_in, D_out=D_out, D_out_p=D_out_p)


# --------------------------------------------------------------------------- #
# Forward
# --------------------------------------------------------------------------- #
def swiglu_apply(x, params, *, tm=1024, mxu_dtype=None):
    """SwiGLU forward:  w3( SiLU(w1 x + b1) * (w2 x + b2) ) + b3.

    x: (..., D_in).  params: output of prepare_swiglu_params().
    tm: token tile (rows per grid step); auto-shrunk to fit VMEM and to keep
        >= 2 token tiles (both v7x TensorCores busy).
    mxu_dtype: force the MXU operand dtype (e.g. jnp.bfloat16); default x.dtype.
    """
    D_in, D_out, D_out_p = params["D_in"], params["D_out"], params["D_out_p"]
    th, H_p = params["th"], params["H_p"]
    nH = H_p // th
    w12, b12, w3_p, b3_p = params["w12"], params["b12"], params["w3"], params["b3"]

    lead = x.shape[:-1]
    assert x.shape[-1] == D_in
    x2d = x.reshape(-1, D_in)
    T = x2d.shape[0]
    out_dtype = x.dtype
    compute_dtype = jnp.dtype(mxu_dtype) if mxu_dtype is not None else jnp.dtype(x.dtype)
    approx = compute_dtype == jnp.dtype(jnp.bfloat16)   # approx EUP recip only on bf16 path

    bytes_x = jnp.dtype(x.dtype).itemsize
    bytes_w = jnp.dtype(w12.dtype).itemsize

    # ---- token tile selection (no activation padding: cdiv grid + partial tile) ----
    gran = 16 if bytes_x <= 2 else 8          # bf16 packs 2 rows / sublane
    tm_eff = min(tm, _round_up(T, gran))
    if T > gran and pl.cdiv(T, tm_eff) < 2:   # keep >= 2 token tiles for megacore
        tm_eff = _round_up(pl.cdiv(T, 2), gran)

    def _vmem_bytes(t):
        return (2 * t * D_in * bytes_x                 # x tile (double buffered)
                + 2 * D_in * 2 * th * bytes_w          # fused w1|w2 block
                + 2 * th * D_out_p * bytes_w           # w3 block
                + 2 * t * D_out_p * bytes_x            # out tile
                + 4 * 2 * th * 4 + 4 * D_out_p         # biases (f32)
                + (t * D_out_p * 4 if nH > 1 else 0))  # f32 accumulator

    while tm_eff > gran and _vmem_bytes(tm_eff) > _VMEM_BUDGET:
        tm_eff = max(gran, _round_up(tm_eff // 2, gran))

    n_tok = pl.cdiv(T, tm_eff)

    if nH > 1:
        # Hidden axis streamed (VMEM-safe for large H on v7x's 64 MiB / TC).
        kernel = functools.partial(_swiglu_stream_kernel, th=th,
                                   compute_dtype=compute_dtype, approx=approx)
        grid_spec = pltpu.PrefetchScalarGridSpec(
            num_scalar_prefetch=0,
            grid=(n_tok, nH),
            in_specs=[
                pl.BlockSpec((tm_eff, D_in), lambda i, h: (i, 0)),    # x tile
                pl.BlockSpec((D_in, 2 * th), lambda i, h: (0, h)),    # fused w1|w2
                pl.BlockSpec((1, 2 * th), lambda i, h: (0, h)),       # fused b1|b2
                pl.BlockSpec((th, D_out_p), lambda i, h: (h, 0)),     # w3 rows
                pl.BlockSpec((1, D_out_p), lambda i, h: (0, 0)),      # b3
            ],
            out_specs=pl.BlockSpec((tm_eff, D_out_p), lambda i, h: (i, 0)),
            scratch_shapes=[pltpu.VMEM((tm_eff, D_out_p), jnp.float32)],
        )
        semantics = ("parallel", "arbitrary")
    else:
        # Weights fully VMEM-resident: single grid axis, no accumulator scratch.
        # NOTE: pipeline_mode=pl.Buffered(1) on the constant-index weight specs
        # could further halve their VMEM footprint; left at the default for
        # portability.
        kernel = functools.partial(_swiglu_resident_kernel, th=th,
                                   compute_dtype=compute_dtype, approx=approx)
        grid_spec = pltpu.PrefetchScalarGridSpec(
            num_scalar_prefetch=0,
            grid=(n_tok,),
            in_specs=[
                pl.BlockSpec((tm_eff, D_in), lambda i: (i, 0)),
                pl.BlockSpec((D_in, 2 * th), lambda i: (0, 0)),
                pl.BlockSpec((1, 2 * th), lambda i: (0, 0)),
                pl.BlockSpec((th, D_out_p), lambda i: (0, 0)),
                pl.BlockSpec((1, D_out_p), lambda i: (0, 0)),
            ],
            out_specs=pl.BlockSpec((tm_eff, D_out_p), lambda i: (i, 0)),
        )
        semantics = ("parallel",)

    out = pl.pallas_call(
        kernel,
        out_shape=jax.ShapeDtypeStruct((T, D_out_p), out_dtype),
        grid_spec=grid_spec,
        compiler_params=pltpu.CompilerParams(
            dimension_semantics=semantics,
            vmem_limit_bytes=_VMEM_LIMIT,
        ),
    )(x2d, w12, b12, w3_p, b3_p)

    if D_out_p != D_out:
        out = out[:, :D_out]
    return out.reshape(*lead, D_out)


def swiglu(x, w1, b1, w2, b2, w3, b3, *, tm=1024, th=1024, mxu_dtype=None):
    """Convenience one-shot wrapper.  For repeated forward calls, hoist
    prepare_swiglu_params() to parameter-load time instead."""
    params = prepare_swiglu_params(w1, b1, w2, b2, w3, b3, th=th)
    return swiglu_apply(x, params, tm=tm, mxu_dtype=mxu_dtype)


# --------------------------------------------------------------------------- #
# Reference + tests
# --------------------------------------------------------------------------- #
def swiglu_ref(x, w1, b1, w2, b2, w3, b3):
    hp = jax.lax.Precision.HIGHEST
    x1 = jnp.dot(x, w1, precision=hp) + b1
    x2 = jnp.dot(x, w2, precision=hp) + b2
    h = (x1 * jax.nn.sigmoid(x1)) * x2
    return jnp.dot(h, w3, precision=hp) + b3


if __name__ == "__main__":
    key = jax.random.PRNGKey(0)

    # ---- small test: shapes consistent with the module (batch=2, seq=8) ----
    B, N = 2, 8
    in_features, hidden_features = 32, 64
    out_features = in_features

    keys = jax.random.split(key, 8)
    x = jax.random.normal(keys[0], (B, N, in_features), dtype=jnp.float32)

    s1 = 1.0 / (in_features ** 0.5)
    s3 = 1.0 / (hidden_features ** 0.5)
    # PyTorch nn.Linear stores weight as (out, in); transpose to (in, out).
    w1 = jax.random.uniform(keys[1], (hidden_features, in_features), jnp.float32, -s1, s1).T
    w2 = jax.random.uniform(keys[2], (hidden_features, in_features), jnp.float32, -s1, s1).T
    w3 = jax.random.uniform(keys[3], (out_features, hidden_features), jnp.float32, -s3, s3).T
    b1 = jax.random.uniform(keys[4], (hidden_features,), jnp.float32, -s1, s1)
    b2 = jax.random.uniform(keys[5], (hidden_features,), jnp.float32, -s1, s1)
    b3 = jax.random.uniform(keys[6], (out_features,), jnp.float32, -s3, s3)

    ref = swiglu_ref(x.reshape(-1, in_features), w1, b1, w2, b2, w3, b3)
    ref = ref.reshape(B, N, out_features)

    params = prepare_swiglu_params(w1, b1, w2, b2, w3, b3)   # hoisted: once per model
    out = swiglu_apply(x, params)
    jax.block_until_ready(out)
    assert out.shape == (B, N, out_features)
    assert jnp.allclose(out, ref, atol=2e-3, rtol=2e-3), \
        float(jnp.max(jnp.abs(out - ref)))

    # ---- bf16 storage / f32 accumulation path (bf16 MXU-peak dtype) ----
    bf = lambda a: a.astype(jnp.bfloat16)
    params_bf = prepare_swiglu_params(bf(w1), b1, bf(w2), b2, bf(w3), b3)
    out_bf = swiglu_apply(bf(x), params_bf)
    jax.block_until_ready(out_bf)
    assert out_bf.dtype == jnp.bfloat16
    assert jnp.allclose(out_bf.astype(jnp.float32), ref, atol=1.5e-1, rtol=1e-1)

    # ---- medium test: multi-tile tokens + ragged last tile + resident weights ----
    T2, D2, H2 = 500, 256, 1024
    km = jax.random.split(keys[7], 7)
    xm = jax.random.normal(km[0], (T2, D2), dtype=jnp.float32)
    sm1 = 1.0 / (D2 ** 0.5)
    sm3 = 1.0 / (H2 ** 0.5)
    wm1 = jax.random.uniform(km[1], (D2, H2), jnp.float32, -sm1, sm1)
    wm2 = jax.random.uniform(km[2], (D2, H2), jnp.float32, -sm1, sm1)
    wm3 = jax.random.uniform(km[3], (H2, D2), jnp.float32, -sm3, sm3)
    bm1 = jax.random.uniform(km[4], (H2,), jnp.float32, -sm1, sm1)
    bm2 = jax.random.uniform(km[5], (H2,), jnp.float32, -sm1, sm1)
    bm3 = jax.random.uniform(km[6], (D2,), jnp.float32, -sm3, sm3)
    refm = swiglu_ref(xm, wm1, bm1, wm2, bm2, wm3, bm3)

    # Resident-weight path (nH == 1): no accumulator, single grid axis.
    pm_res = prepare_swiglu_params(wm1, bm1, wm2, bm2, wm3, bm3, th=1024)
    outm = swiglu_apply(xm, pm_res, tm=1024)
    jax.block_until_ready(outm)
    assert jnp.allclose(outm, refm, atol=1e-2, rtol=1e-2), \
        float(jnp.max(jnp.abs(outm - refm)))

    # Streamed-hidden path (nH == 4): exercises the f32 accumulator kernel.
    pm_str = prepare_swiglu_params(wm1, bm1, wm2, bm2, wm3, bm3, th=256)
    outs = swiglu_apply(xm, pm_str, tm=256)
    jax.block_until_ready(outs)
    assert jnp.allclose(outs, refm, atol=1e-2, rtol=1e-2), \
        float(jnp.max(jnp.abs(outs - refm)))

    print("KERNEL_OK")
</pallas_src>

<mosaic_0001>
module attributes {stable_mosaic.version = 11 : i64} {
  func.func @_swiglu_resident_kernel(%arg0: i32, %arg1: memref<8x32xf32, #tpu.memory_space<vmem>>, %arg2: memref<32x256xf32, #tpu.memory_space<vmem>>, %arg3: memref<1x256xf32, #tpu.memory_space<vmem>>, %arg4: memref<128x128xf32, #tpu.memory_space<vmem>>, %arg5: memref<1x128xf32, #tpu.memory_space<vmem>>, %arg6: memref<8x128xf32, #tpu.memory_space<vmem>>) attributes {dimension_semantics = [#tpu.dimension_semantics<parallel>], iteration_bounds = array<i64: 2>, scalar_prefetch = 0 : i64, scratch_operands = 0 : i64, tpu.core_type = #tpu.core_type<tc>, window_params = [{transform_indices = @transform_0, window_bounds = array<i64: 8, 32>}, {pipeline_mode = #tpu.pipeline_mode<synchronous>, transform_indices = @transform_1, window_bounds = array<i64: 32, 256>}, {pipeline_mode = #tpu.pipeline_mode<synchronous>, transform_indices = @transform_2, window_bounds = array<i64: 1, 256>}, {pipeline_mode = #tpu.pipeline_mode<synchronous>, transform_indices = @transform_3, window_bounds = array<i64: 128, 128>}, {pipeline_mode = #tpu.pipeline_mode<synchronous>, transform_indices = @transform_4, window_bounds = array<i64: 1, 128>}, {transform_indices = @transform_5, window_bounds = array<i64: 8, 128>}]} {
    %c0 = arith.constant 0 : index
    %c0_0 = arith.constant 0 : index
    %0 = vector.load %arg1[%c0, %c0_0] : memref<8x32xf32, #tpu.memory_space<vmem>>, vector<8x32xf32>
    %c0_1 = arith.constant 0 : index
    %c0_2 = arith.constant 0 : index
    %1 = vector.load %arg2[%c0_1, %c0_2] : memref<32x256xf32, #tpu.memory_space<vmem>>, vector<32x256xf32>
    %cst = arith.constant dense<0.000000e+00> : vector<8x256xf32>
    %2 = tpu.matmul %0, %1, %cst {dimension_numbers = #tpu.dot_dimension_numbers<[1], [0], [0], [1], [0, 0, 1, 1], [], []>} : vector<8x32xf32>, vector<32x256xf32>, vector<8x256xf32> -> vector<8x256xf32>
    %c0_3 = arith.constant 0 : index
    %c0_4 = arith.constant 0 : index
    %3 = vector.load %arg3[%c0_3, %c0_4] : memref<1x256xf32, #tpu.memory_space<vmem>>, vector<1x256xf32>
    %4 = vector.broadcast %3 : vector<1x256xf32> to vector<8x256xf32>
    %5 = arith.addf %2, %4 : vector<8x256xf32>
    %6 = vector.extract_strided_slice %5 {offsets = [0, 0], sizes = [8, 128], strides = [1, 1]} : vector<8x256xf32> to vector<8x128xf32>
    %7 = vector.extract_strided_slice %5 {offsets = [0, 128], sizes = [8, 128], strides = [1, 1]} : vector<8x256xf32> to vector<8x128xf32>
    %cst_5 = arith.constant 0.000000e+00 : f32
    %8 = vector.broadcast %cst_5 : f32 to vector<8x128xf32>
    %9 = arith.subf %8, %6 : vector<8x128xf32>
    %10 = math.exp %9 : vector<8x128xf32>
    %cst_6 = arith.constant 1.000000e+00 : f32
    %11 = vector.broadcast %cst_6 : f32 to vector<8x128xf32>
    %12 = arith.addf %11, %10 : vector<8x128xf32>
    %13 = tpu.reciprocal %12 : vector<8x128xf32> -> vector<8x128xf32>
    %14 = arith.mulf %6, %13 : vector<8x128xf32>
    %15 = arith.mulf %14, %7 : vector<8x128xf32>
    %c0_7 = arith.constant 0 : index
    %c0_8 = arith.constant 0 : index
    %16 = vector.load %arg4[%c0_7, %c0_8] : memref<128x128xf32, #tpu.memory_space<vmem>>, vector<128x128xf32>
    %cst_9 = arith.constant dense<0.000000e+00> : vector<8x128xf32>
    %17 = tpu.matmul %15, %16, %cst_9 {dimension_numbers = #tpu.dot_dimension_numbers<[1], [0], [0], [1], [0, 0, 1, 1], [], []>} : vector<8x128xf32>, vector<128x128xf32>, vector<8x128xf32> -> vector<8x128xf32>
    %c0_10 = arith.constant 0 : index
    %c0_11 = arith.constant 0 : index
    %18 = vector.load %arg5[%c0_10, %c0_11] : memref<1x128xf32, #tpu.memory_space<vmem>>, vector<1x128xf32>
    %19 = vector.broadcast %18 : vector<1x128xf32> to vector<8x128xf32>
    %20 = arith.addf %17, %19 : vector<8x128xf32>
    %c0_12 = arith.constant 0 : index
    %c0_13 = arith.constant 0 : index
    %21 = vector.load %arg6[%c0_12, %c0_13] : memref<8x128xf32, #tpu.memory_space<vmem>>, vector<8x128xf32>
    tpu.vector_store %arg6[%c0_12, %c0_13], %20 {strides = array<i32>} : memref<8x128xf32, #tpu.memory_space<vmem>>, vector<8x128xf32>,
    return
  }
  func.func @transform_0(%arg0: i32) -> (i32, i32) {
    %c0_i32 = arith.constant 0 : i32
    %c0_i32_0 = arith.constant 0 : i32
    return %arg0, %c0_i32 : i32, i32
  }
  func.func @transform_1(%arg0: i32) -> (i32, i32) {
    %c0_i32 = arith.constant 0 : i32
    %c0_i32_0 = arith.constant 0 : i32
    %c0_i32_1 = arith.constant 0 : i32
    return %c0_i32, %c0_i32_0 : i32, i32
  }
  func.func @transform_2(%arg0: i32) -> (i32, i32) {
    %c0_i32 = arith.constant 0 : i32
    %c0_i32_0 = arith.constant 0 : i32
    %c0_i32_1 = arith.constant 0 : i32
    return %c0_i32, %c0_i32_0 : i32, i32
  }
  func.func @transform_3(%arg0: i32) -> (i32, i32) {
    %c0_i32 = arith.constant 0 : i32
    %c0_i32_0 = arith.constant 0 : i32
    %c0_i32_1 = arith.constant 0 : i32
    return %c0_i32, %c0_i32_0 : i32, i32
  }
  func.func @transform_4(%arg0: i32) -> (i32, i32) {
    %c0_i32 = arith.constant 0 : i32
    %c0_i32_0 = arith.constant 0 : i32
    %c0_i32_1 = arith.constant 0 : i32
    return %c0_i32, %c0_i32_0 : i32, i32
  }
  func.func @transform_5(%arg0: i32) -> (i32, i32) {
    %c0_i32 = arith.constant 0 : i32
    %c0_i32_0 = arith.constant 0 : i32
    return %arg0, %c0_i32 : i32, i32
  }
}

</mosaic_0001>

<bundles_post_ra>
// kernel: tpu_custom_call.1
= control target key start
LH: loop header
LB: loop body
LE: loop exit
PB: predicated region body
PF: predicated region fallthrough
CT: control target
= control target key end

     0   :  { %10 = vsyncpa [#allocation3], 0  ;;  %s1189_s0 = inlined_call_operand.hbm [shape: f32[16,32], index: 0, kind: input, shape index: {}]   ;;  %s1190_s1 = inlined_call_operand.hbm [shape: f32[32,256], index: 1, kind: input, shape index: {}]   ;;  %s1191_s2 = inlined_call_operand.vmem [shape: f32[1,256], index: 2, kind: input, shape index: {}]   ;;  %s1192_s3 = inlined_call_operand.hbm [shape: f32[128,128], index: 3, kind: input, shape index: {}]   ;;  %s1193_s4 = inlined_call_operand.vmem [shape: f32[1,128], index: 4, kind: input, shape index: {}]   ;;  %s1194_s5 = inlined_call_operand.hbm [shape: f32[16,128], index: 5, kind: output, shape index: {}]  }
   0x1   :  { %12 = vsyncpa [#allocation3 + $0x1], 0 }
   0x2   :  { %13 = vsyncpa [#allocation6], 0 }
   0x3   :  { %14 = vsyncpa [#allocation4], 0 }
   0x4   :  { %16 = vsyncpa [#allocation4 + $0x1], 0  ;;  %s948_s18 = smov 0   ;;  %s950_s19 = smov 0  }
   0x5   :  { %s952_s20 = smov 0   ;;  %s954_s21 = smov 0  }
   0x6 LB: > { %s969_s22 = sadd.s32 4294967295, %s905_s21   ;;  %s569_s23 = sadd.s32 4294967294, %s905_s21   ;;  %s905_s21 = sphi %s954_s21, %s1214_s21   ;;  %s901_s20 = sphi %s952_s20, %s1213_s20   ;;  %s897_s19 = sphi %s950_s19, %s1212_s19   ;;  %s893_s18 = sphi %s948_s18, %s1211_s18  }
   0x7   : > { %p42_p0 = scmp.ne.s32.totalorder %s897_s19, %s893_s18  ;;  %p1195_p1 = scmp.eq.s32.totalorder %s969_s22, 0 }
   0x8   : > { %p156_p3 = scmp.eq.s32.totalorder %s569_s23, 1  ;;  %p570_p5 = scmp.ge.s32.totalorder %s905_s21, 1 }
   0x9   : > { %p978_p4 = por %p1195_p1, %p42_p0  ;;  %p163_p7 = scmp.lt.s32.totalorder %s905_s21, 3 }
   0xa   : > { %p983_p6 = por %p156_p3, %p42_p0  ;;  %s907_s27 = smov [#allocation5]  }
   0xb   : > { %s1198_s24 = scalar_select %p978_p4, 1, 0 }
   0xc   : > { %s1199_s25 = scalar_select %p983_p6, 1, 0 }
   0xd   : > { %p988_p8 = pnand %p570_p5, %p163_p7  ;;  %s175_s28 = sshll.u32 %s907_s27, 4  ;;  %s992_s28 = int_to_ptr.vmem [resolvable:$true] %s175_s28 }
   0xe   : > { %s908_s30 = smov [#allocation7]   ;;  %s749_s9 = scalar_lea.hbm %s1190_s1, 1024 }
   0xf   : > { %p683_p9 = pneg %p988_p8  ;;  %s191_s6 = sshll.u32 %s908_s30, 4  ;;  %s1003_s6 = int_to_ptr.vmem [resolvable:$true] %s191_s6 }
  0x10   : > { %p750_p12 = scmp.ne.s32.totalorder %s1190_s1, %s749_s9  ;;  %p756_p5 = scmp.lt.u32.totalorder %s749_s9, %s1190_s1 }
  0x11   : > { %p999_p11 = pnand %p683_p9, %p1195_p1 }
  0x13   : > { %p751_p13 = pneg %p999_p11 }
  0x15   : > { %p752_p0 = pnand %p751_p13, %p750_p12 }
  0x17   : > { %p753_p3 = pneg %p752_p0 }
  0x19   : > { %p758_p7 = pnand %p756_p5, %p753_p3 }
  0x1b   : > { %761 = shalt.err (!%p758_p7)
}
  0x1c   : > { %s762_s14 = scalar_lea.vmem %s992_s28, 1024  ;;  %p770_p2 = scmp.lt.s32.totalorder %s992_s28, %s992_s28 }
  0x1d   : > { %p763_p9 = scmp.ne.s32.totalorder %s992_s28, %s762_s14  ;;  %p771_p12 = scmp.lt.s32.totalorder %s762_s14, %s762_s14 }
  0x1f   : > { %p765_p10 = pnand %p763_p9, %p751_p13  ;;  %p772_p0 = por %p771_p12, %p770_p2 }
  0x21   : > { %p766_p1 = pneg %p765_p10 }
  0x23   : > { %p773_p6 = pnand %p772_p0, %p766_p1 }
  0x25   : > { %776 = shalt.err (!%p773_p6)
}
  0x26   : > { %s909_s15 = smov 256   ;;  %s910_s16 = smov 16  }
  0x27   : > { %686 = dma.hbm_to_vmem [thread:$0]  (!%p999_p11), %s1190_s1, 1024, %s992_s28, [#allocation6], %s909_s15, %s909_s15, %s910_s16  }
  0x28   : > { %s777_s7 = scalar_lea.hbm %s1192_s3, 2048 }
  0x29   : > { %p778_p2 = scmp.ne.s32.totalorder %s1192_s3, %s777_s7  ;;  %p784_p10 = scmp.lt.u32.totalorder %s777_s7, %s1192_s3 }
  0x2b   : > { %p780_p1 = pnand %p778_p2, %p751_p13 }
  0x2d   : > { %p781_p6 = pneg %p780_p1 }
  0x2f   : > { %p786_p3 = pnand %p784_p10, %p781_p6 }
  0x31   : > { %789 = shalt.err (!%p786_p3)
}
  0x32   : > { %s790_s28 = scalar_lea.vmem %s1003_s6, 2048  ;;  %p798_p12 = scmp.lt.s32.totalorder %s1003_s6, %s1003_s6 }
  0x33   : > { %p791_p5 = scmp.ne.s32.totalorder %s1003_s6, %s790_s28  ;;  %p799_p0 = scmp.lt.s32.totalorder %s790_s28, %s790_s28 }
  0x35   : > { %p793_p7 = pnand %p791_p5, %p751_p13  ;;  %p800_p2 = por %p799_p0, %p798_p12 }
  0x37   : > { %p794_p9 = pneg %p793_p7 }
  0x39   : > { %p801_p1 = pnand %p800_p2, %p794_p9 }
  0x3b   : > { %804 = shalt.err (!%p801_p1)
}
  0x3c   : > { %s911_s12 = smov 128   ;;  %s912_s13 = smov 8  }
  0x3d   : > { %689 = dma.hbm_to_vmem [thread:$0]  (!%p999_p11), %s1192_s3, 2048, %s1003_s6, [#allocation6], %s911_s12, %s911_s12, %s912_s13  }
  0x3e   : > { %s1058_s16 = sadd.s32 1, %s905_s21   ;;  %s29_s23 = sadd.s32 1, %s901_s20 }
  0x3f   : > { %s26_s17 = ssub.s32 %s905_s21, %s1058_s16  ;;  %p36_p6 = scmp.ne.s32.totalorder %s901_s20, %s897_s19 }
  0x40   : > { %p27_p13 = scmp.eq.s32.totalorder %s26_s17, 0  ;;  %p37_p10 = scmp.eq.s32.totalorder %s905_s21, 0 }
  0x41   : > { %p1202_p5 = scmp.eq.s32.totalorder %s969_s22, 1  ;;  %p700_p9 = scmp.lt.s32.totalorder %s905_s21, 2 }
  0x42   : > { %s1067_s27 = scalar_select %p27_p13, %s901_s20, %s29_s23  }
  0x43   : > { %p38_p3 = por %p37_p10, %p36_p6  ;;  %p1071_p7 = por %p1202_p5, %p36_p6 }
  0x44   : > { %s208_s29 = sand.u32 1, %s901_s20   ;;  %s575_s6 = sshll.u32 %s905_s21, 7 }
  0x45   : > { %s1203_s30 = scalar_select %p1071_p7, 1, 0 }
  0x46   : > { %s574_s7 = sshll.u32 %s208_s29, 3  ;;  %s1081_s10 = scalar_lea.hbm %s1189_s0, %s575_s6 }
  0x47   : > { %s212_s11 = scalar_lea.vmem [#allocation2], %s574_s7  ;;  %p1085_p11 = pnand %p700_p9, %p38_p3 }
  0x48   : > { %s219_s28 = sshll.u32 %s212_s11, 4  ;;  %s209_s13 = scalar_lea.sflag [#allocation3], %s208_s29  ;;  %s1083_s28 = int_to_ptr.vmem [resolvable:$true] %s219_s28 }
  0x49   : > { %s805_s14 = scalar_lea.hbm %s1081_s10, 128  ;;  %p807_p0 = pneg %p1085_p11 }
  0x4a   : > { %p806_p12 = scmp.ne.s32.totalorder %s1081_s10, %s805_s14  ;;  %s810_s23 = scalar_lea.hbm %s1189_s0, 256 }
  0x4b   : > { %p811_p13 = scmp.lt.u32.totalorder %s1081_s10, %s1189_s0  ;;  %p812_p6 = scmp.lt.u32.totalorder %s810_s23, %s805_s14 }
  0x4c   : > { %p808_p2 = pnand %p807_p0, %p806_p12  ;;  %p814_p3 = scmp.lt.u32.totalorder %s805_s14, %s1081_s10 }
  0x4d   : > { %p813_p10 = por %p812_p6, %p811_p13 }
  0x4e   : > { %p809_p1 = pneg %p808_p2 }
  0x4f   : > { %p815_p5 = por %p814_p3, %p813_p10 }
  0x51   : > { %p816_p9 = pnand %p815_p5, %p809_p1 }
  0x53   : > { %819 = shalt.err (!%p816_p9)
}
  0x54   : > { %s820_s29 = scalar_lea.vmem %s1083_s28, 128  ;;  %s913_s8 = smov [#allocation2]  }
  0x55   : > { %p821_p12 = scmp.ne.s32.totalorder %s1083_s28, %s820_s29  ;;  %s825_s9 = sshll.u32 %s913_s8, 4  ;;  %s826_s9 = int_to_ptr.vmem [resolvable:$false] %s825_s9 }
  0x56   : > { %s827_s11 = scalar_lea.vmem %s826_s9, 256  ;;  %p828_p4 = scmp.lt.s32.totalorder %s1083_s28, %s826_s9 }
  0x57   : > { %p823_p2 = pnand %p821_p12, %p807_p0  ;;  %p829_p13 = scmp.lt.s32.totalorder %s827_s11, %s820_s29 }
  0x59   : > { %p824_p7 = pneg %p823_p2  ;;  %p830_p6 = por %p829_p13, %p828_p4 }
  0x5b   : > { %p831_p10 = pnand %p830_p6, %p824_p7 }
  0x5d   : > { %834 = shalt.err (!%p831_p10)
}
  0x5e   : > { %693 = dma.hbm_to_vmem [thread:$0]  (!%p1085_p11), %s1081_s10, 128, %s1083_s28, %s209_s13  }
  0x5f   : > { %228 = sbr.rel (%p988_p8) target bundleno = 591 (0x24f), region = 40  ;;  %s1117_s14 = sand.u32 (!%p988_p8), 1, %s897_s19  }
  0x60   : > { %s577_s15 = sshll.u32 (!%p988_p8), %s1117_s14, 3  ;;  %s231_s17 = scalar_lea.sflag (!%p988_p8), [#allocation3], %s1117_s14 }
  0x61   : > { %s234_s23 = scalar_lea.vmem (!%p988_p8), [#allocation2], %s577_s15  ;;  %p1205_p4 = scmp.ne.s32.totalorder (!%p988_p8), %s1198_s24, 0 }
  0x66   : > { %880 = dma.done.wait (%p1205_p4), %s231_s17, 128  }
  0x67   : > { %882 = vsyncadd (%p1205_p4), %s231_s17, 4294967168  ;;  %p1206_p7 = scmp.eq.s32.totalorder %s969_s22, 0 }
  0x69   : > { %884 = dma.done.wait (%p1206_p7), [#allocation6], 3072   ;;  %p1207_p8 = pmov %p1206_p7 }
  0x6a   : > { %v914_v0 = vmov 0.0   ;;  %v271_v1 = vld [vmem:[#allocation5 + $0x8] sm:$0xff]  ;;  %v273_v2 = vld [vmem:[#allocation5 + $0x18] sm:$0xff]  ;;  %v270_v3 = vld [vmem:[#allocation5] sm:$0xff]  ;;  %vm290_vm0 = vcmask 261120   ;;  %v915_v17 = vmov 0.0|0.0   ;;  %v280_v39 = vlaneseq }
  0x6b   : > { %886 = vsyncadd (%p1207_p8), [#allocation6], 4294964224  ;;  %358 = vmatprep.mubr.f32.mxu0 %v914_v0  ;;  %v639_v4 = vpack.c.bf16 %v273_v2, %v271_v1  ;;  %v272_v5 = vld [vmem:[#allocation5 + $0x10] sm:$0xff]  ;;  %v275_v6 = vld [vmem:[#allocation5 + $0x28] sm:$0xff]  ;;  %647 = vmatprep.subr.bf16.mxu1 %v915_v17  ;;  %vm916_vm1 = vmmov 0   ;;  %s584_s12 = sshll.u32 %s969_s22, 7 }
  0x6c   : > { %v277_v7 = vld [vmem:[#allocation5 + $0x38] sm:$0xff]  ;;  %v641_v8 = vpack.c.bf16 %v272_v5, %v270_v3  ;;  %v274_v10 = vld [vmem:[#allocation5 + $0x20] sm:$0xff]  ;;  %v276_v11 = vld [vmem:[#allocation5 + $0x30] sm:$0xff]  ;;  %636 = vmatprep.mubr.msk.f32.mxu1 %vm916_vm1, %v914_v0  ;;  %v281_v40 = vshrl.u32 %v280_v39, 7  ;;  %s268_s13 = scalar_lea.vmem [#allocation8], %s577_s15  ;;  %s1145_s8 = scalar_lea.hbm %s1194_s5, %s584_s12 }
  0x6d   : > { %v643_v9 = vpack.c.bf16 %v277_v7, %v275_v6  ;;  %640 = vmatprep.subr.bf16.mxu0 %v639_v4  ;;  %v645_v12 = vpack.c.bf16 %v276_v11, %v274_v10  ;;  %v269_v13 = vld [vmem:[%s234_s23] sm:$0xff]  ;;  %v372_v14 = vld [vmem:[#allocation7] sm:$0xff]  ;;  %v373_v15 = vld [vmem:[#allocation7 + $0x8] sm:$0xff]  ;;  %s480_s7 = sshll.u32 %s268_s13, 4  ;;  %s467_s9 = scalar_lea.sflag [#allocation4], %s1117_s14  ;;  %s1147_s7 = int_to_ptr.vmem [resolvable:$true] %s480_s7 }
  0x6e   : > { %642 = vmatpush1.bf16.msra.mxu0 %v641_v8  ;;  %v648_v16 = vpack.c.bf16 %v373_v15, %v372_v14  ;;  %v374_v18 = vld [vmem:[#allocation7 + $0x10] sm:$0xff]  ;;  %v375_v19 = vld [vmem:[#allocation7 + $0x18] sm:$0xff]  ;;  %v376_v21 = vld [vmem:[#allocation7 + $0x20] sm:$0xff]  ;;  %v282_v41 = vsub.s32 0, %v281_v40  ;;  %v286_v51 = vsub.s32 1, %v281_v40  ;;  %s835_s11 = scalar_lea.vmem %s1147_s7, 128 }
  0x6f   : > { %644 = vmatprep.subr.bf16.mxu0 %v643_v9  ;;  %v651_v20 = vpack.c.bf16 %v375_v19, %v374_v18  ;;  %v377_v22 = vld [vmem:[#allocation7 + $0x28] sm:$0xff]  ;;  %v378_v24 = vld [vmem:[#allocation7 + $0x30] sm:$0xff]  ;;  %v379_v25 = vld [vmem:[#allocation7 + $0x38] sm:$0xff]  ;;  %p836_p11 = scmp.ne.s32.totalorder %s1147_s7, %s835_s11  ;;  %p1208_p0 = scmp.ne.s32.totalorder %s1203_s30, 0 }
  0x70   : > { %649 = vmatpush3.bf16.msra.mxu1 %v648_v16  ;;  %v654_v23 = vpack.c.bf16 %v377_v22, %v376_v21  ;;  %v657_v26 = vpack.c.bf16 %v379_v25, %v378_v24  ;;  %v380_v27 = vld [vmem:[#allocation7 + $0x40] sm:$0xff]  ;;  %v381_v28 = vld [vmem:[#allocation7 + $0x48] sm:$0xff]  ;;  %v382_v30 = vld [vmem:[#allocation7 + $0x50] sm:$0xff]  ;;  %s917_s22 = smov [#allocation8]  }
  0x71   : > { %650 = vmatprep.subr.bf16.mxu1 %v915_v17  ;;  %v660_v29 = vpack.c.bf16 %v381_v28, %v380_v27  ;;  %v383_v31 = vld [vmem:[#allocation7 + $0x58] sm:$0xff]  ;;  %v384_v33 = vld [vmem:[#allocation7 + $0x60] sm:$0xff]  ;;  %v385_v34 = vld [vmem:[#allocation7 + $0x68] sm:$0xff]  ;;  %p837_p1 = pnand %p836_p11, %p1208_p0  ;;  %s839_s15 = sshll.u32 %s917_s22, 4  ;;  %s840_s15 = int_to_ptr.vmem [resolvable:$false] %s839_s15 }
  0x72   : > { %646 = vmatpush1.bf16.msra.mxu0 %v645_v12  ;;  %v663_v32 = vpack.c.bf16 %v383_v31, %v382_v30  ;;  %v666_v35 = vpack.c.bf16 %v385_v34, %v384_v33  ;;  %v386_v36 = vld [vmem:[#allocation7 + $0x70] sm:$0xff]  ;;  %v387_v37 = vld [vmem:[#allocation7 + $0x78] sm:$0xff]  ;;  %s841_s17 = scalar_lea.vmem %s840_s15, 256  ;;  %p842_p5 = scmp.lt.s32.totalorder %s1147_s7, %s840_s15 }
  0x73   : > { %v669_v38 = vpack.c.bf16 %v387_v37, %v386_v36  ;;  %v278_v42 = vld [vmem:[%s1191_s2] sm:$0x3]  ;;  %p838_p3 = pneg %p837_p1  ;;  %p843_p9 = scmp.lt.s32.totalorder %s841_s17, %s835_s11 }
  0x74   : > { %652 = vmatpush3.bf16.msra.mxu1 %v651_v20  ;;  %v283_v43 = vrot.slane %v278_v42, %v282_v41  ;;  %v287_v52 = vrot.slane %v278_v42, %v286_v51  ;;  %v582_v57 = vld [vmem:[%s1193_s4] ss:$0 sm:$0xff] }
  0x75   : > { %581 = vmatmul.mubr.msk.f32.vlgmr.msra.gmra.mrb[0].mxu0 %vm290_vm0, %v269_v13  ;;  %653 = vmatprep.subr.bf16.mxu1 %v915_v17  ;;  %p844_p12 = por %p843_p9, %p842_p5 }
  0x77   : > { %p845_p2 = pnand %p844_p12, %p838_p3 }
  0x78   : > { %655 = vmatpush3.bf16.msra.mxu1 %v654_v23 }
  0x79   : > { %656 = vmatprep.subr.bf16.mxu1 %v915_v17 }
  0x7c   : > { %658 = vmatpush3.bf16.msra.mxu1 %v657_v26 }
  0x7d   : > { %659 = vmatprep.subr.bf16.mxu1 %v915_v17 }
  0x80   : > { %661 = vmatpush3.bf16.msra.mxu1 %v660_v29 }
  0x81   : > { %662 = vmatprep.subr.bf16.mxu1 %v915_v17 }
  0x84   : > { %664 = vmatpush3.bf16.msra.mxu1 %v663_v32 }
  0x85   : > { %665 = vmatprep.subr.bf16.mxu1 %v915_v17 }
  0x88   : > { %667 = vmatpush3.bf16.msra.mxu1 %v666_v35 }
  0x89   : > { %668 = vmatprep.subr.bf16.mxu1 %v915_v17 }
  0x8c   : > { %670 = vmatpush3.bf16.msra.mxu1 %v669_v38 }
 0x148   : > { %v360_v44 = vpop.f32.mrb[0].mxu0 }
 0x149   : > { %v361_v45 = vadd.f32 %v360_v44, %v283_v43  ;;  %v362_v46 = vpop.f32.mrb[1].mxu0 }
 0x14a   : > { %v363_v55 = vadd.f32 %v362_v46, %v287_v52 }
 0x14b   : > { %v365_v47 = vsub.f32 0.0, %v361_v45 }
 0x14d   : > { %v366_v48 = vmul.f32 1.442695, %v365_v47 }
 0x14f   : > { %745 = vpow2.f32 %v366_v48 }
 0x159   : > { %v746_v49 = vpop.eup %745 }
 0x15a   : > { %v368_v50 = vadd.f32 1.0, %v746_v49 }
 0x15c   : > { %747 = vrcp.f32 %v368_v50 }
 0x166   : > { %v748_v53 = vpop.eup %747 }
 0x167   : > { %v370_v54 = vmul.f32 %v748_v53, %v361_v45 }
 0x169   : > { %v371_v56 = vmul.f32 %v370_v54, %v363_v55 }
 0x16b   : > { %637 = vmatmul.mubr.f32.vlgmr.msra.gmra.mrb[0].mxu1 %v371_v56 }
 0x23e   : > { %v461_v58 = vpop.f32.mrb[0].mxu1 }
 0x23f   : > { %v462_v59 = vadd.f32 %v582_v57, %v461_v58  ;;  %v638_v60 = vpop.f32.mrb[1].mxu1 }
 0x241   : > { %465 = vst [vmem:[%s268_s13] sm:$0xff] %v462_v59 }
 0x242   : > { %848 = shalt.err (!%p845_p2)
}
 0x243   : > { %s849_s14 = scalar_lea.hbm %s1145_s8, 128  ;;  %s853_s26 = scalar_lea.hbm %s1194_s5, 256 }
 0x244   : > { %p850_p13 = scmp.ne.s32.totalorder %s1145_s8, %s849_s14  ;;  %p854_p4 = scmp.lt.u32.totalorder %s1145_s8, %s1194_s5 }
 0x245   : > { %p855_p7 = scmp.lt.u32.totalorder %s853_s26, %s849_s14  ;;  %p857_p11 = scmp.lt.u32.totalorder %s849_s14, %s1145_s8 }
 0x246   : > { %p851_p6 = pnand %p850_p13, %p1208_p0 }
 0x247   : > { %p856_p8 = por %p855_p7, %p854_p4 }
 0x248   : > { %p852_p10 = pneg %p851_p6 }
 0x249   : > { %p858_p1 = por %p857_p11, %p856_p8 }
 0x24b   : > { %p859_p3 = pnand %p858_p1, %p852_p10 }
 0x24d   : > { %862 = shalt.err (!%p859_p3)
}
 0x24e   : > { %681 = dma.vmem_to_hbm [thread:$0]  (%p1208_p0), %s1147_s7, 128, %s1145_s8, %s467_s9  }
 0x24f PF: > { %s492_s12 = sand.u32 1, %s893_s18   ;;  %p1209_p5 = scmp.ne.s32.totalorder %s1199_s25, 0 }
 0x250   : > { %p1210_p9 = scmp.ge.s32.totalorder %s905_s21, 2  ;;  %s493_s13 = scalar_lea.sflag [#allocation4], %s492_s12 }
 0x252   : > { %p695_p12 = pnand %p1210_p9, %p1209_p5 }
 0x254   : > { %888 = dma.done.wait (!%p695_p12), %s493_s13, 128  }
 0x255   : > { %890 = vsyncadd (!%p695_p12), %s493_s13, 4294967168  ;;  %p19_p2 = scmp.ge.s32.totalorder %s1058_s16, 4   ;;  %s1211_s18 = smov %s897_s19 }
 0x256   : > { %s1212_s19 = smov %s901_s20  ;;  %s1213_s20 = smov %s1067_s27 }
 0x257   : > { %s1214_s21 = smov %s1058_s16  ;;  %21 = sbr.rel (!%p19_p2) target bundleno = 6 (0x6), region = 93 }
 0x25e   :  { %498 = vsyncpa [#allocation3], 1 }
 0x25f   :  { %500 = vsyncpa [#allocation3 + $0x1], 1 }
 0x260   :  { %501 = vsyncpa [#allocation6], 1 }
 0x261   :  { %502 = vsyncpa [#allocation4], 1 }
 0x262   :  { %504 = vsyncpa [#allocation4 + $0x1], 1 }

</bundles_post_ra>
